<compile_context>
chip_gen: v5e
topology: v5e:2x2
jax: 0.10.0
libtpu: 0.0.40
codegen_flags: <defaults>
</compile_context>

<pallas_src>
import functools

import jax
import jax.numpy as jnp
from jax import lax
from jax.experimental import pallas as pl
from jax.experimental.pallas import tpu as pltpu

IN_DIM = 2
HID_DIM = 8
OUT_DIM = 4
LANE = 128            # lane width
SUB = 8               # f32 sublanes per vreg
MAX_TILE_ROWS = 64    # rows per grid step (64*128 = 8192 batch elements)


def policy_forward_kernel(x_ref, w1_ref, b1_ref, w2_ref, b2_ref, o_ref, *, groups):
    """x_ref: VMEM [IN_DIM, tile_rows, 128]; w/b: SMEM (PyTorch [out,in] layout);
    o_ref: VMEM [OUT_DIM, tile_rows, 128]."""

    def compute_group(r0):
        x0 = x_ref[0, pl.ds(r0, SUB), :]                 # [8, 128] full vreg
        x1 = x_ref[1, pl.ds(r0, SUB), :]

        # fc1 + tanh: h_j = tanh(w1[j,0]*x0 + w1[j,1]*x1 + b1[j])  (VPU MLAs, EUP tanh)
        h = [jnp.tanh(x0 * w1_ref[j, 0] + x1 * w1_ref[j, 1] + b1_ref[j])
             for j in range(HID_DIM)]

        # fc2: logits_k = sum_j w2[k,j]*h_j + b2[k]  (unrolled VPU MLAs)
        logits = []
        for k in range(OUT_DIM):
            acc = h[0] * w2_ref[k, 0]
            for j in range(1, HID_DIM):
                acc = acc + h[j] * w2_ref[k, j]
            logits.append(acc + b2_ref[k])

        # Softmax over the 4 logit planes (max/add on VPU, exp on EUP, exact divide).
        m = jnp.maximum(jnp.maximum(logits[0], logits[1]),
                        jnp.maximum(logits[2], logits[3]))
        e = [jnp.exp(l - m) for l in logits]
        denom = e[0] + e[1] + e[2] + e[3]
        inv = 1.0 / denom                                # exact: rows sum to 1
        for k in range(OUT_DIM):
            o_ref[k, pl.ds(r0, SUB), :] = e[k] * inv     # full-vreg stores

    if groups == 1:
        compute_group(0)
    else:
        def body(g, carry):
            compute_group(pl.multiple_of(g * SUB, SUB))
            return carry
        lax.fori_loop(0, groups, body, 0, unroll=2)


@jax.jit
def policy_forward(x, w1, b1, w2, b2):
    """x: [B, 2]; weights in PyTorch layout (w1 [8,2], b1 [8], w2 [4,8], b2 [4]).

    Returns probs: [B, 4] f32 == softmax(tanh(x@W1.T+b1)@W2.T+b2, axis=-1).
    """
    B = x.shape[0]
    lane_rows = pl.cdiv(B, LANE)                               # lanes of 128
    tile_rows = max(SUB, min(MAX_TILE_ROWS, pl.cdiv(lane_rows, SUB) * SUB))
    rows = pl.cdiv(lane_rows, tile_rows) * tile_rows           # multiple of tile_rows
    Bp = rows * LANE
    n_elem = Bp

    # Single pad, then pack feature-major: [B,2] -> [2, rows, 128].
    xp = jnp.pad(x.astype(jnp.float32), ((0, Bp - B), (0, 0)))
    xt = xp.T.reshape(IN_DIM, rows, LANE)

    grid = (rows // tile_rows,)
    kernel = functools.partial(policy_forward_kernel, groups=tile_rows // SUB)

    out_t = pl.pallas_call(
        kernel,
        out_shape=jax.ShapeDtypeStruct((OUT_DIM, rows, LANE), jnp.float32),
        grid=grid,
        in_specs=[
            pl.BlockSpec((IN_DIM, tile_rows, LANE), lambda i: (0, i, 0)),
            pl.BlockSpec(memory_space=pltpu.MemorySpace.SMEM),   # w1 [8, 2]
            pl.BlockSpec(memory_space=pltpu.MemorySpace.SMEM),   # b1 [8]
            pl.BlockSpec(memory_space=pltpu.MemorySpace.SMEM),   # w2 [4, 8]
            pl.BlockSpec(memory_space=pltpu.MemorySpace.SMEM),   # b2 [4]
        ],
        out_specs=pl.BlockSpec((OUT_DIM, tile_rows, LANE), lambda i: (0, i, 0)),
        compiler_params=pltpu.CompilerParams(
            dimension_semantics=("parallel",)),                  # v7x: 2 TCs split batch
        cost_estimate=pl.CostEstimate(
            flops=n_elem * (2 * IN_DIM * HID_DIM + 2 * HID_DIM * OUT_DIM + 16),
            transcendentals=n_elem * (HID_DIM + OUT_DIM + 1),
            bytes_accessed=n_elem * (IN_DIM + OUT_DIM) * 4),
    )(xt,
      w1.astype(jnp.float32), b1.astype(jnp.float32),
      w2.astype(jnp.float32), b2.astype(jnp.float32))

    # Unpack: [4, rows, 128] -> [Bp, 4] -> [B, 4].
    return out_t.reshape(OUT_DIM, Bp).T[:B]


def init_params(key):
    """Deterministic init matching nn.Linear shapes (PyTorch [out, in] layout)."""
    k1, k2, k3, k4 = jax.random.split(key, 4)
    lim1 = 1.0 / jnp.sqrt(2.0)   # fc1 fan_in = 2
    lim2 = 1.0 / jnp.sqrt(8.0)   # fc2 fan_in = 8
    w1 = jax.random.uniform(k1, (HID_DIM, IN_DIM), jnp.float32, -lim1, lim1)
    b1 = jax.random.uniform(k2, (HID_DIM,), jnp.float32, -lim1, lim1)
    w2 = jax.random.uniform(k3, (OUT_DIM, HID_DIM), jnp.float32, -lim2, lim2)
    b2 = jax.random.uniform(k4, (OUT_DIM,), jnp.float32, -lim2, lim2)
    return w1, b1, w2, b2


if __name__ == "__main__":
    key = jax.random.PRNGKey(0)
    k_params, k_x = jax.random.split(key)
    w1, b1, w2, b2 = init_params(k_params)

    # One lane-width of 2-dim states (e.g. CartPole-ish states).
    B = 128
    x = jax.random.normal(k_x, (B, IN_DIM), jnp.float32)

    probs = jax.block_until_ready(policy_forward(x, w1, b1, w2, b2))

    # Pure-JAX reference of the same forward pass.
    ref = jax.nn.softmax(jnp.tanh(x @ w1.T + b1) @ w2.T + b2, axis=-1)
    assert probs.shape == (B, OUT_DIM)
    assert jnp.allclose(probs, ref, atol=1e-4, rtol=1e-4), "mismatch vs reference"
    assert jnp.allclose(jnp.sum(probs, axis=-1), 1.0, atol=1e-5)

    print("KERNEL_OK")
</pallas_src>

<mosaic_0001>
module attributes {stable_mosaic.version = 11 : i64} {
  func.func @policy_forward_kernel(%arg0: i32, %arg1: memref<2x8x128xf32, #tpu.memory_space<vmem>>, %arg2: memref<8x2xf32, #tpu.memory_space<smem>>, %arg3: memref<8xf32, #tpu.memory_space<smem>>, %arg4: memref<4x8xf32, #tpu.memory_space<smem>>, %arg5: memref<4xf32, #tpu.memory_space<smem>>, %arg6: memref<4x8x128xf32, #tpu.memory_space<vmem>>) attributes {dimension_semantics = [#tpu.dimension_semantics<parallel>], iteration_bounds = array<i64: 1>, scalar_prefetch = 0 : i64, scratch_operands = 0 : i64, tpu.core_type = #tpu.core_type<tc>, window_params = [{transform_indices = @transform_0, window_bounds = array<i64: 2, 8, 128>}, {transform_indices = @transform_1, window_bounds = array<i64: 8, 2>}, {transform_indices = @transform_2, window_bounds = array<i64: 8>}, {transform_indices = @transform_3, window_bounds = array<i64: 4, 8>}, {transform_indices = @transform_4, window_bounds = array<i64: 4>}, {transform_indices = @transform_5, window_bounds = array<i64: 4, 8, 128>}]} {
    %c0 = arith.constant 0 : index
    %c0_0 = arith.constant 0 : index
    %c0_1 = arith.constant 0 : index
    %0 = vector.load %arg1[%c0, %c0_0, %c0_1] : memref<2x8x128xf32, #tpu.memory_space<vmem>>, vector<1x8x128xf32>
    %1 = vector.shape_cast %0 : vector<1x8x128xf32> to vector<8x128xf32>
    %c1 = arith.constant 1 : index
    %c0_2 = arith.constant 0 : index
    %c0_3 = arith.constant 0 : index
    %2 = vector.load %arg1[%c1, %c0_2, %c0_3] : memref<2x8x128xf32, #tpu.memory_space<vmem>>, vector<1x8x128xf32>
    %3 = vector.shape_cast %2 : vector<1x8x128xf32> to vector<8x128xf32>
    %c0_4 = arith.constant 0 : index
    %c0_5 = arith.constant 0 : index
    %4 = memref.load %arg2[%c0_4, %c0_5] : memref<8x2xf32, #tpu.memory_space<smem>>
    %5 = vector.broadcast %4 : f32 to vector<8x128xf32>
    %6 = arith.mulf %1, %5 : vector<8x128xf32>
    %c0_6 = arith.constant 0 : index
    %c1_7 = arith.constant 1 : index
    %7 = memref.load %arg2[%c0_6, %c1_7] : memref<8x2xf32, #tpu.memory_space<smem>>
    %8 = vector.broadcast %7 : f32 to vector<8x128xf32>
    %9 = arith.mulf %3, %8 : vector<8x128xf32>
    %10 = arith.addf %6, %9 : vector<8x128xf32>
    %c0_8 = arith.constant 0 : index
    %11 = memref.load %arg3[%c0_8] : memref<8xf32, #tpu.memory_space<smem>>
    %12 = vector.broadcast %11 : f32 to vector<8x128xf32>
    %13 = arith.addf %10, %12 : vector<8x128xf32>
    %14 = math.tanh %13 : vector<8x128xf32>
    %c1_9 = arith.constant 1 : index
    %c0_10 = arith.constant 0 : index
    %15 = memref.load %arg2[%c1_9, %c0_10] : memref<8x2xf32, #tpu.memory_space<smem>>
    %16 = vector.broadcast %15 : f32 to vector<8x128xf32>
    %17 = arith.mulf %1, %16 : vector<8x128xf32>
    %c1_11 = arith.constant 1 : index
    %c1_12 = arith.constant 1 : index
    %18 = memref.load %arg2[%c1_11, %c1_12] : memref<8x2xf32, #tpu.memory_space<smem>>
    %19 = vector.broadcast %18 : f32 to vector<8x128xf32>
    %20 = arith.mulf %3, %19 : vector<8x128xf32>
    %21 = arith.addf %17, %20 : vector<8x128xf32>
    %c1_13 = arith.constant 1 : index
    %22 = memref.load %arg3[%c1_13] : memref<8xf32, #tpu.memory_space<smem>>
    %23 = vector.broadcast %22 : f32 to vector<8x128xf32>
    %24 = arith.addf %21, %23 : vector<8x128xf32>
    %25 = math.tanh %24 : vector<8x128xf32>
    %c2 = arith.constant 2 : index
    %c0_14 = arith.constant 0 : index
    %26 = memref.load %arg2[%c2, %c0_14] : memref<8x2xf32, #tpu.memory_space<smem>>
    %27 = vector.broadcast %26 : f32 to vector<8x128xf32>
    %28 = arith.mulf %1, %27 : vector<8x128xf32>
    %c2_15 = arith.constant 2 : index
    %c1_16 = arith.constant 1 : index
    %29 = memref.load %arg2[%c2_15, %c1_16] : memref<8x2xf32, #tpu.memory_space<smem>>
    %30 = vector.broadcast %29 : f32 to vector<8x128xf32>
    %31 = arith.mulf %3, %30 : vector<8x128xf32>
    %32 = arith.addf %28, %31 : vector<8x128xf32>
    %c2_17 = arith.constant 2 : index
    %33 = memref.load %arg3[%c2_17] : memref<8xf32, #tpu.memory_space<smem>>
    %34 = vector.broadcast %33 : f32 to vector<8x128xf32>
    %35 = arith.addf %32, %34 : vector<8x128xf32>
    %36 = math.tanh %35 : vector<8x128xf32>
    %c3 = arith.constant 3 : index
    %c0_18 = arith.constant 0 : index
    %37 = memref.load %arg2[%c3, %c0_18] : memref<8x2xf32, #tpu.memory_space<smem>>
    %38 = vector.broadcast %37 : f32 to vector<8x128xf32>
    %39 = arith.mulf %1, %38 : vector<8x128xf32>
    %c3_19 = arith.constant 3 : index
    %c1_20 = arith.constant 1 : index
    %40 = memref.load %arg2[%c3_19, %c1_20] : memref<8x2xf32, #tpu.memory_space<smem>>
    %41 = vector.broadcast %40 : f32 to vector<8x128xf32>
    %42 = arith.mulf %3, %41 : vector<8x128xf32>
    %43 = arith.addf %39, %42 : vector<8x128xf32>
    %c3_21 = arith.constant 3 : index
    %44 = memref.load %arg3[%c3_21] : memref<8xf32, #tpu.memory_space<smem>>
    %45 = vector.broadcast %44 : f32 to vector<8x128xf32>
    %46 = arith.addf %43, %45 : vector<8x128xf32>
    %47 = math.tanh %46 : vector<8x128xf32>
    %c4 = arith.constant 4 : index
    %c0_22 = arith.constant 0 : index
    %48 = memref.load %arg2[%c4, %c0_22] : memref<8x2xf32, #tpu.memory_space<smem>>
    %49 = vector.broadcast %48 : f32 to vector<8x128xf32>
    %50 = arith.mulf %1, %49 : vector<8x128xf32>
    %c4_23 = arith.constant 4 : index
    %c1_24 = arith.constant 1 : index
    %51 = memref.load %arg2[%c4_23, %c1_24] : memref<8x2xf32, #tpu.memory_space<smem>>
    %52 = vector.broadcast %51 : f32 to vector<8x128xf32>
    %53 = arith.mulf %3, %52 : vector<8x128xf32>
    %54 = arith.addf %50, %53 : vector<8x128xf32>
    %c4_25 = arith.constant 4 : index
    %55 = memref.load %arg3[%c4_25] : memref<8xf32, #tpu.memory_space<smem>>
    %56 = vector.broadcast %55 : f32 to vector<8x128xf32>
    %57 = arith.addf %54, %56 : vector<8x128xf32>
    %58 = math.tanh %57 : vector<8x128xf32>
    %c5 = arith.constant 5 : index
    %c0_26 = arith.constant 0 : index
    %59 = memref.load %arg2[%c5, %c0_26] : memref<8x2xf32, #tpu.memory_space<smem>>
    %60 = vector.broadcast %59 : f32 to vector<8x128xf32>
    %61 = arith.mulf %1, %60 : vector<8x128xf32>
    %c5_27 = arith.constant 5 : index
    %c1_28 = arith.constant 1 : index
    %62 = memref.load %arg2[%c5_27, %c1_28] : memref<8x2xf32, #tpu.memory_space<smem>>
    %63 = vector.broadcast %62 : f32 to vector<8x128xf32>
    %64 = arith.mulf %3, %63 : vector<8x128xf32>
    %65 = arith.addf %61, %64 : vector<8x128xf32>
    %c5_29 = arith.constant 5 : index
    %66 = memref.load %arg3[%c5_29] : memref<8xf32, #tpu.memory_space<smem>>
    %67 = vector.broadcast %66 : f32 to vector<8x128xf32>
    %68 = arith.addf %65, %67 : vector<8x128xf32>
    %69 = math.tanh %68 : vector<8x128xf32>
    %c6 = arith.constant 6 : index
    %c0_30 = arith.constant 0 : index
    %70 = memref.load %arg2[%c6, %c0_30] : memref<8x2xf32, #tpu.memory_space<smem>>
    %71 = vector.broadcast %70 : f32 to vector<8x128xf32>
    %72 = arith.mulf %1, %71 : vector<8x128xf32>
    %c6_31 = arith.constant 6 : index
    %c1_32 = arith.constant 1 : index
    %73 = memref.load %arg2[%c6_31, %c1_32] : memref<8x2xf32, #tpu.memory_space<smem>>
    %74 = vector.broadcast %73 : f32 to vector<8x128xf32>
    %75 = arith.mulf %3, %74 : vector<8x128xf32>
    %76 = arith.addf %72, %75 : vector<8x128xf32>
    %c6_33 = arith.constant 6 : index
    %77 = memref.load %arg3[%c6_33] : memref<8xf32, #tpu.memory_space<smem>>
    %78 = vector.broadcast %77 : f32 to vector<8x128xf32>
    %79 = arith.addf %76, %78 : vector<8x128xf32>
    %80 = math.tanh %79 : vector<8x128xf32>
    %c7 = arith.constant 7 : index
    %c0_34 = arith.constant 0 : index
    %81 = memref.load %arg2[%c7, %c0_34] : memref<8x2xf32, #tpu.memory_space<smem>>
    %82 = vector.broadcast %81 : f32 to vector<8x128xf32>
    %83 = arith.mulf %1, %82 : vector<8x128xf32>
    %c7_35 = arith.constant 7 : index
    %c1_36 = arith.constant 1 : index
    %84 = memref.load %arg2[%c7_35, %c1_36] : memref<8x2xf32, #tpu.memory_space<smem>>
    %85 = vector.broadcast %84 : f32 to vector<8x128xf32>
    %86 = arith.mulf %3, %85 : vector<8x128xf32>
    %87 = arith.addf %83, %86 : vector<8x128xf32>
    %c7_37 = arith.constant 7 : index
    %88 = memref.load %arg3[%c7_37] : memref<8xf32, #tpu.memory_space<smem>>
    %89 = vector.broadcast %88 : f32 to vector<8x128xf32>
    %90 = arith.addf %87, %89 : vector<8x128xf32>
    %91 = math.tanh %90 : vector<8x128xf32>
    %c0_38 = arith.constant 0 : index
    %c0_39 = arith.constant 0 : index
    %92 = memref.load %arg4[%c0_38, %c0_39] : memref<4x8xf32, #tpu.memory_space<smem>>
    %93 = vector.broadcast %92 : f32 to vector<8x128xf32>
    %94 = arith.mulf %14, %93 : vector<8x128xf32>
    %c0_40 = arith.constant 0 : index
    %c1_41 = arith.constant 1 : index
    %95 = memref.load %arg4[%c0_40, %c1_41] : memref<4x8xf32, #tpu.memory_space<smem>>
    %96 = vector.broadcast %95 : f32 to vector<8x128xf32>
    %97 = arith.mulf %25, %96 : vector<8x128xf32>
    %98 = arith.addf %94, %97 : vector<8x128xf32>
    %c0_42 = arith.constant 0 : index
    %c2_43 = arith.constant 2 : index
    %99 = memref.load %arg4[%c0_42, %c2_43] : memref<4x8xf32, #tpu.memory_space<smem>>
    %100 = vector.broadcast %99 : f32 to vector<8x128xf32>
    %101 = arith.mulf %36, %100 : vector<8x128xf32>
    %102 = arith.addf %98, %101 : vector<8x128xf32>
    %c0_44 = arith.constant 0 : index
    %c3_45 = arith.constant 3 : index
    %103 = memref.load %arg4[%c0_44, %c3_45] : memref<4x8xf32, #tpu.memory_space<smem>>
    %104 = vector.broadcast %103 : f32 to vector<8x128xf32>
    %105 = arith.mulf %47, %104 : vector<8x128xf32>
    %106 = arith.addf %102, %105 : vector<8x128xf32>
    %c0_46 = arith.constant 0 : index
    %c4_47 = arith.constant 4 : index
    %107 = memref.load %arg4[%c0_46, %c4_47] : memref<4x8xf32, #tpu.memory_space<smem>>
    %108 = vector.broadcast %107 : f32 to vector<8x128xf32>
    %109 = arith.mulf %58, %108 : vector<8x128xf32>
    %110 = arith.addf %106, %109 : vector<8x128xf32>
    %c0_48 = arith.constant 0 : index
    %c5_49 = arith.constant 5 : index
    %111 = memref.load %arg4[%c0_48, %c5_49] : memref<4x8xf32, #tpu.memory_space<smem>>
    %112 = vector.broadcast %111 : f32 to vector<8x128xf32>
    %113 = arith.mulf %69, %112 : vector<8x128xf32>
    %114 = arith.addf %110, %113 : vector<8x128xf32>
    %c0_50 = arith.constant 0 : index
    %c6_51 = arith.constant 6 : index
    %115 = memref.load %arg4[%c0_50, %c6_51] : memref<4x8xf32, #tpu.memory_space<smem>>
    %116 = vector.broadcast %115 : f32 to vector<8x128xf32>
    %117 = arith.mulf %80, %116 : vector<8x128xf32>
    %118 = arith.addf %114, %117 : vector<8x128xf32>
    %c0_52 = arith.constant 0 : index
    %c7_53 = arith.constant 7 : index
    %119 = memref.load %arg4[%c0_52, %c7_53] : memref<4x8xf32, #tpu.memory_space<smem>>
    %120 = vector.broadcast %119 : f32 to vector<8x128xf32>
    %121 = arith.mulf %91, %120 : vector<8x128xf32>
    %122 = arith.addf %118, %121 : vector<8x128xf32>
    %c0_54 = arith.constant 0 : index
    %123 = memref.load %arg5[%c0_54] : memref<4xf32, #tpu.memory_space<smem>>
    %124 = vector.broadcast %123 : f32 to vector<8x128xf32>
    %125 = arith.addf %122, %124 : vector<8x128xf32>
    %c1_55 = arith.constant 1 : index
    %c0_56 = arith.constant 0 : index
    %126 = memref.load %arg4[%c1_55, %c0_56] : memref<4x8xf32, #tpu.memory_space<smem>>
    %127 = vector.broadcast %126 : f32 to vector<8x128xf32>
    %128 = arith.mulf %14, %127 : vector<8x128xf32>
    %c1_57 = arith.constant 1 : index
    %c1_58 = arith.constant 1 : index
    %129 = memref.load %arg4[%c1_57, %c1_58] : memref<4x8xf32, #tpu.memory_space<smem>>
    %130 = vector.broadcast %129 : f32 to vector<8x128xf32>
    %131 = arith.mulf %25, %130 : vector<8x128xf32>
    %132 = arith.addf %128, %131 : vector<8x128xf32>
    %c1_59 = arith.constant 1 : index
    %c2_60 = arith.constant 2 : index
    %133 = memref.load %arg4[%c1_59, %c2_60] : memref<4x8xf32, #tpu.memory_space<smem>>
    %134 = vector.broadcast %133 : f32 to vector<8x128xf32>
    %135 = arith.mulf %36, %134 : vector<8x128xf32>
    %136 = arith.addf %132, %135 : vector<8x128xf32>
    %c1_61 = arith.constant 1 : index
    %c3_62 = arith.constant 3 : index
    %137 = memref.load %arg4[%c1_61, %c3_62] : memref<4x8xf32, #tpu.memory_space<smem>>
    %138 = vector.broadcast %137 : f32 to vector<8x128xf32>
    %139 = arith.mulf %47, %138 : vector<8x128xf32>
    %140 = arith.addf %136, %139 : vector<8x128xf32>
    %c1_63 = arith.constant 1 : index
    %c4_64 = arith.constant 4 : index
    %141 = memref.load %arg4[%c1_63, %c4_64] : memref<4x8xf32, #tpu.memory_space<smem>>
    %142 = vector.broadcast %141 : f32 to vector<8x128xf32>
    %143 = arith.mulf %58, %142 : vector<8x128xf32>
    %144 = arith.addf %140, %143 : vector<8x128xf32>
    %c1_65 = arith.constant 1 : index
    %c5_66 = arith.constant 5 : index
    %145 = memref.load %arg4[%c1_65, %c5_66] : memref<4x8xf32, #tpu.memory_space<smem>>
    %146 = vector.broadcast %145 : f32 to vector<8x128xf32>
    %147 = arith.mulf %69, %146 : vector<8x128xf32>
    %148 = arith.addf %144, %147 : vector<8x128xf32>
    %c1_67 = arith.constant 1 : index
    %c6_68 = arith.constant 6 : index
    %149 = memref.load %arg4[%c1_67, %c6_68] : memref<4x8xf32, #tpu.memory_space<smem>>
    %150 = vector.broadcast %149 : f32 to vector<8x128xf32>
    %151 = arith.mulf %80, %150 : vector<8x128xf32>
    %152 = arith.addf %148, %151 : vector<8x128xf32>
    %c1_69 = arith.constant 1 : index
    %c7_70 = arith.constant 7 : index
    %153 = memref.load %arg4[%c1_69, %c7_70] : memref<4x8xf32, #tpu.memory_space<smem>>
    %154 = vector.broadcast %153 : f32 to vector<8x128xf32>
    %155 = arith.mulf %91, %154 : vector<8x128xf32>
    %156 = arith.addf %152, %155 : vector<8x128xf32>
    %c1_71 = arith.constant 1 : index
    %157 = memref.load %arg5[%c1_71] : memref<4xf32, #tpu.memory_space<smem>>
    %158 = vector.broadcast %157 : f32 to vector<8x128xf32>
    %159 = arith.addf %156, %158 : vector<8x128xf32>
    %c2_72 = arith.constant 2 : index
    %c0_73 = arith.constant 0 : index
    %160 = memref.load %arg4[%c2_72, %c0_73] : memref<4x8xf32, #tpu.memory_space<smem>>
    %161 = vector.broadcast %160 : f32 to vector<8x128xf32>
    %162 = arith.mulf %14, %161 : vector<8x128xf32>
    %c2_74 = arith.constant 2 : index
    %c1_75 = arith.constant 1 : index
    %163 = memref.load %arg4[%c2_74, %c1_75] : memref<4x8xf32, #tpu.memory_space<smem>>
    %164 = vector.broadcast %163 : f32 to vector<8x128xf32>
    %165 = arith.mulf %25, %164 : vector<8x128xf32>
    %166 = arith.addf %162, %165 : vector<8x128xf32>
    %c2_76 = arith.constant 2 : index
    %c2_77 = arith.constant 2 : index
    %167 = memref.load %arg4[%c2_76, %c2_77] : memref<4x8xf32, #tpu.memory_space<smem>>
    %168 = vector.broadcast %167 : f32 to vector<8x128xf32>
    %169 = arith.mulf %36, %168 : vector<8x128xf32>
    %170 = arith.addf %166, %169 : vector<8x128xf32>
    %c2_78 = arith.constant 2 : index
    %c3_79 = arith.constant 3 : index
    %171 = memref.load %arg4[%c2_78, %c3_79] : memref<4x8xf32, #tpu.memory_space<smem>>
    %172 = vector.broadcast %171 : f32 to vector<8x128xf32>
    %173 = arith.mulf %47, %172 : vector<8x128xf32>
    %174 = arith.addf %170, %173 : vector<8x128xf32>
    %c2_80 = arith.constant 2 : index
    %c4_81 = arith.constant 4 : index
    %175 = memref.load %arg4[%c2_80, %c4_81] : memref<4x8xf32, #tpu.memory_space<smem>>
    %176 = vector.broadcast %175 : f32 to vector<8x128xf32>
    %177 = arith.mulf %58, %176 : vector<8x128xf32>
    %178 = arith.addf %174, %177 : vector<8x128xf32>
    %c2_82 = arith.constant 2 : index
    %c5_83 = arith.constant 5 : index
    %179 = memref.load %arg4[%c2_82, %c5_83] : memref<4x8xf32, #tpu.memory_space<smem>>
    %180 = vector.broadcast %179 : f32 to vector<8x128xf32>
    %181 = arith.mulf %69, %180 : vector<8x128xf32>
    %182 = arith.addf %178, %181 : vector<8x128xf32>
    %c2_84 = arith.constant 2 : index
    %c6_85 = arith.constant 6 : index
    %183 = memref.load %arg4[%c2_84, %c6_85] : memref<4x8xf32, #tpu.memory_space<smem>>
    %184 = vector.broadcast %183 : f32 to vector<8x128xf32>
    %185 = arith.mulf %80, %184 : vector<8x128xf32>
    %186 = arith.addf %182, %185 : vector<8x128xf32>
    %c2_86 = arith.constant 2 : index
    %c7_87 = arith.constant 7 : index
    %187 = memref.load %arg4[%c2_86, %c7_87] : memref<4x8xf32, #tpu.memory_space<smem>>
    %188 = vector.broadcast %187 : f32 to vector<8x128xf32>
    %189 = arith.mulf %91, %188 : vector<8x128xf32>
    %190 = arith.addf %186, %189 : vector<8x128xf32>
    %c2_88 = arith.constant 2 : index
    %191 = memref.load %arg5[%c2_88] : memref<4xf32, #tpu.memory_space<smem>>
    %192 = vector.broadcast %191 : f32 to vector<8x128xf32>
    %193 = arith.addf %190, %192 : vector<8x128xf32>
    %c3_89 = arith.constant 3 : index
    %c0_90 = arith.constant 0 : index
    %194 = memref.load %arg4[%c3_89, %c0_90] : memref<4x8xf32, #tpu.memory_space<smem>>
    %195 = vector.broadcast %194 : f32 to vector<8x128xf32>
    %196 = arith.mulf %14, %195 : vector<8x128xf32>
    %c3_91 = arith.constant 3 : index
    %c1_92 = arith.constant 1 : index
    %197 = memref.load %arg4[%c3_91, %c1_92] : memref<4x8xf32, #tpu.memory_space<smem>>
    %198 = vector.broadcast %197 : f32 to vector<8x128xf32>
    %199 = arith.mulf %25, %198 : vector<8x128xf32>
    %200 = arith.addf %196, %199 : vector<8x128xf32>
    %c3_93 = arith.constant 3 : index
    %c2_94 = arith.constant 2 : index
    %201 = memref.load %arg4[%c3_93, %c2_94] : memref<4x8xf32, #tpu.memory_space<smem>>
    %202 = vector.broadcast %201 : f32 to vector<8x128xf32>
    %203 = arith.mulf %36, %202 : vector<8x128xf32>
    %204 = arith.addf %200, %203 : vector<8x128xf32>
    %c3_95 = arith.constant 3 : index
    %c3_96 = arith.constant 3 : index
    %205 = memref.load %arg4[%c3_95, %c3_96] : memref<4x8xf32, #tpu.memory_space<smem>>
    %206 = vector.broadcast %205 : f32 to vector<8x128xf32>
    %207 = arith.mulf %47, %206 : vector<8x128xf32>
    %208 = arith.addf %204, %207 : vector<8x128xf32>
    %c3_97 = arith.constant 3 : index
    %c4_98 = arith.constant 4 : index
    %209 = memref.load %arg4[%c3_97, %c4_98] : memref<4x8xf32, #tpu.memory_space<smem>>
    %210 = vector.broadcast %209 : f32 to vector<8x128xf32>
    %211 = arith.mulf %58, %210 : vector<8x128xf32>
    %212 = arith.addf %208, %211 : vector<8x128xf32>
    %c3_99 = arith.constant 3 : index
    %c5_100 = arith.constant 5 : index
    %213 = memref.load %arg4[%c3_99, %c5_100] : memref<4x8xf32, #tpu.memory_space<smem>>
    %214 = vector.broadcast %213 : f32 to vector<8x128xf32>
    %215 = arith.mulf %69, %214 : vector<8x128xf32>
    %216 = arith.addf %212, %215 : vector<8x128xf32>
    %c3_101 = arith.constant 3 : index
    %c6_102 = arith.constant 6 : index
    %217 = memref.load %arg4[%c3_101, %c6_102] : memref<4x8xf32, #tpu.memory_space<smem>>
    %218 = vector.broadcast %217 : f32 to vector<8x128xf32>
    %219 = arith.mulf %80, %218 : vector<8x128xf32>
    %220 = arith.addf %216, %219 : vector<8x128xf32>
    %c3_103 = arith.constant 3 : index
    %c7_104 = arith.constant 7 : index
    %221 = memref.load %arg4[%c3_103, %c7_104] : memref<4x8xf32, #tpu.memory_space<smem>>
    %222 = vector.broadcast %221 : f32 to vector<8x128xf32>
    %223 = arith.mulf %91, %222 : vector<8x128xf32>
    %224 = arith.addf %220, %223 : vector<8x128xf32>
    %c3_105 = arith.constant 3 : index
    %225 = memref.load %arg5[%c3_105] : memref<4xf32, #tpu.memory_space<smem>>
    %226 = vector.broadcast %225 : f32 to vector<8x128xf32>
    %227 = arith.addf %224, %226 : vector<8x128xf32>
    %228 = arith.maximumf %125, %159 : vector<8x128xf32>
    %229 = arith.maximumf %193, %227 : vector<8x128xf32>
    %230 = arith.maximumf %228, %229 : vector<8x128xf32>
    %231 = arith.subf %125, %230 : vector<8x128xf32>
    %232 = math.exp %231 : vector<8x128xf32>
    %233 = arith.subf %159, %230 : vector<8x128xf32>
    %234 = math.exp %233 : vector<8x128xf32>
    %235 = arith.subf %193, %230 : vector<8x128xf32>
    %236 = math.exp %235 : vector<8x128xf32>
    %237 = arith.subf %227, %230 : vector<8x128xf32>
    %238 = math.exp %237 : vector<8x128xf32>
    %239 = arith.addf %232, %234 : vector<8x128xf32>
    %240 = arith.addf %239, %236 : vector<8x128xf32>
    %241 = arith.addf %240, %238 : vector<8x128xf32>
    %cst = arith.constant 1.000000e+00 : f32
    %242 = vector.broadcast %cst : f32 to vector<8x128xf32>
    %243 = arith.divf %242, %241 : vector<8x128xf32>
    %244 = arith.mulf %232, %243 : vector<8x128xf32>
    %c0_106 = arith.constant 0 : index
    %c0_107 = arith.constant 0 : index
    %c0_108 = arith.constant 0 : index
    %245 = vector.load %arg6[%c0_106, %c0_107, %c0_108] : memref<4x8x128xf32, #tpu.memory_space<vmem>>, vector<1x8x128xf32>
    %246 = vector.shape_cast %245 : vector<1x8x128xf32> to vector<8x128xf32>
    %247 = vector.shape_cast %244 : vector<8x128xf32> to vector<1x8x128xf32>
    tpu.vector_store %arg6[%c0_106, %c0_107, %c0_108], %247 {strides = array<i32>} : memref<4x8x128xf32, #tpu.memory_space<vmem>>, vector<1x8x128xf32>,
    %248 = arith.mulf %234, %243 : vector<8x128xf32>
    %c1_109 = arith.constant 1 : index
    %c0_110 = arith.constant 0 : index
    %c0_111 = arith.constant 0 : index
    %249 = vector.load %arg6[%c1_109, %c0_110, %c0_111] : memref<4x8x128xf32, #tpu.memory_space<vmem>>, vector<1x8x128xf32>
    %250 = vector.shape_cast %249 : vector<1x8x128xf32> to vector<8x128xf32>
    %251 = vector.shape_cast %248 : vector<8x128xf32> to vector<1x8x128xf32>
    tpu.vector_store %arg6[%c1_109, %c0_110, %c0_111], %251 {strides = array<i32>} : memref<4x8x128xf32, #tpu.memory_space<vmem>>, vector<1x8x128xf32>,
    %252 = arith.mulf %236, %243 : vector<8x128xf32>
    %c2_112 = arith.constant 2 : index
    %c0_113 = arith.constant 0 : index
    %c0_114 = arith.constant 0 : index
    %253 = vector.load %arg6[%c2_112, %c0_113, %c0_114] : memref<4x8x128xf32, #tpu.memory_space<vmem>>, vector<1x8x128xf32>
    %254 = vector.shape_cast %253 : vector<1x8x128xf32> to vector<8x128xf32>
    %255 = vector.shape_cast %252 : vector<8x128xf32> to vector<1x8x128xf32>
    tpu.vector_store %arg6[%c2_112, %c0_113, %c0_114], %255 {strides = array<i32>} : memref<4x8x128xf32, #tpu.memory_space<vmem>>, vector<1x8x128xf32>,
    %256 = arith.mulf %238, %243 : vector<8x128xf32>
    %c3_115 = arith.constant 3 : index
    %c0_116 = arith.constant 0 : index
    %c0_117 = arith.constant 0 : index
    %257 = vector.load %arg6[%c3_115, %c0_116, %c0_117] : memref<4x8x128xf32, #tpu.memory_space<vmem>>, vector<1x8x128xf32>
    %258 = vector.shape_cast %257 : vector<1x8x128xf32> to vector<8x128xf32>
    %259 = vector.shape_cast %256 : vector<8x128xf32> to vector<1x8x128xf32>
    tpu.vector_store %arg6[%c3_115, %c0_116, %c0_117], %259 {strides = array<i32>} : memref<4x8x128xf32, #tpu.memory_space<vmem>>, vector<1x8x128xf32>,
    return
  }
  func.func @transform_0(%arg0: i32) -> (i32, i32, i32) {
    %c0_i32 = arith.constant 0 : i32
    %c0_i32_0 = arith.constant 0 : i32
    %c0_i32_1 = arith.constant 0 : i32
    return %c0_i32, %arg0, %c0_i32_0 : i32, i32, i32
  }
  func.func @transform_1(%arg0: i32) -> (i32, i32) {
    %c0_i32 = arith.constant 0 : i32
    %c0_i32_0 = arith.constant 0 : i32
    %c0_i32_1 = arith.constant 0 : i32
    return %c0_i32, %c0_i32_0 : i32, i32
  }
  func.func @transform_2(%arg0: i32) -> i32 {
    %c0_i32 = arith.constant 0 : i32
    %c0_i32_0 = arith.constant 0 : i32
    return %c0_i32 : i32
  }
  func.func @transform_3(%arg0: i32) -> (i32, i32) {
    %c0_i32 = arith.constant 0 : i32
    %c0_i32_0 = arith.constant 0 : i32
    %c0_i32_1 = arith.constant 0 : i32
    return %c0_i32, %c0_i32_0 : i32, i32
  }
  func.func @transform_4(%arg0: i32) -> i32 {
    %c0_i32 = arith.constant 0 : i32
    %c0_i32_0 = arith.constant 0 : i32
    return %c0_i32 : i32
  }
  func.func @transform_5(%arg0: i32) -> (i32, i32, i32) {
    %c0_i32 = arith.constant 0 : i32
    %c0_i32_0 = arith.constant 0 : i32
    %c0_i32_1 = arith.constant 0 : i32
    return %c0_i32, %arg0, %c0_i32_0 : i32, i32, i32
  }
}

</mosaic_0001>

<bundles_post_ra>
// kernel: policy_forward.1
= control target key start
LH: loop header
LB: loop body
LE: loop exit
PB: predicated region body
PF: predicated region fallthrough
CT: control target
= control target key end

     0   :  { %10 = vsyncpa [#allocation3], 0  ;;  %s748_s0 = inlined_call_operand.vmem [shape: f32[2,8,128], index: 0, kind: input, shape index: {}]   ;;  %s749_s1 = inlined_call_operand.vmem [shape: f32[8,2], index: 1, kind: input, shape index: {}]   ;;  %s750_s2 = inlined_call_operand.vmem [shape: f32[8], index: 2, kind: input, shape index: {}]   ;;  %s751_s3 = inlined_call_operand.vmem [shape: f32[4,8], index: 3, kind: input, shape index: {}]   ;;  %s752_s4 = inlined_call_operand.vmem [shape: f32[4], index: 4, kind: input, shape index: {}]   ;;  %s753_s5 = inlined_call_operand.vmem [shape: f32[4,8,128], index: 5, kind: output, shape index: {}]  }
   0x1   :  { %11 = vsyncpa [#allocation5], 0  ;;  %s29_s20 = sshll.u32 %s750_s2, 4  ;;  %s30_s20 = int_to_ptr.vmem [resolvable:$true] %s29_s20 }
   0x2   :  { %12 = vsyncpa [#allocation8], 0  ;;  %s20_s23 = sshll.u32 %s749_s1, 4  ;;  %s490_s24 = smov [#allocation4]   ;;  %s21_s23 = int_to_ptr.vmem [resolvable:$true] %s20_s23 }
   0x3   :  { %32 = dma.vmem_to_smem %s30_s20, 16, %s490_s24, [#allocation5]  }
   0x4   :  { %s491_s25 = smov [#allocation2]   ;;  %s38_s28 = sshll.u32 %s751_s3, 4  ;;  %s39_s28 = int_to_ptr.vmem [resolvable:$true] %s38_s28 }
   0x5   :  { %23 = dma.vmem_to_smem %s21_s23, 128, %s491_s25, [#allocation3]  }
   0x6   :  { %s47_s2 = sshll.u32 %s752_s4, 4  ;;  %s492_s6 = smov [#allocation6]   ;;  %s48_s2 = int_to_ptr.vmem [resolvable:$true] %s47_s2 }
   0x7   :  { %41 = dma.vmem_to_smem %s39_s28, 64, %s492_s6, [#allocation5]  }
   0x8   :  { %s493_s7 = smov [#allocation7]  }
   0x9   :  { %50 = dma.vmem_to_smem %s48_s2, 16, %s493_s7, [#allocation8]  }
   0xa   :  { %484 = dma.done.wait [#allocation3], 128  }
   0xb   :  { %485 = vsyncadd [#allocation3], 4294967168 }
   0xc   :  { %486 = dma.done.wait [#allocation5], 80  }
   0xd   :  { %487 = vsyncadd [#allocation5], 4294967216 }
   0xe   :  { %488 = dma.done.wait [#allocation8], 16  }
   0xf   :  { %489 = vsyncadd [#allocation8], 4294967280 }
  0x10   :  { %67 = sfence }
  0x11   :  { %s71_s1 = sld [smem:[#allocation2]]  ;;  %v545_v0 = vld [vmem:[%s748_s0] sm:$0xff]  ;;  %v550_v1 = vld [vmem:[%s748_s0 + $0x8] sm:$0xff] }
  0x12   :  { %s347_s8 = sld [smem:[#allocation2 + $0x1]] }
  0x13   :  { %s348_s3 = sld [smem:[#allocation2 + $0x80]] }
  0x14   :  { %s349_s9 = sld [smem:[#allocation2 + $0x81]] }
  0x15   :  { %s536_s10 = sld [smem:[#allocation4]] }
  0x16   :  { %s538_s11 = sld [smem:[#allocation4 + $0x1]] }
  0x17   :  { %s351_s4 = sld [smem:[#allocation2 + $0x100]]  ;;  %v72_v2 = vstv %s71_s1 }
  0x18   :  { %s352_s12 = sld [smem:[#allocation2 + $0x101]]  ;;  %v75_v3 = vstv %s347_s8  ;;  %v73_v6 = vmul.f32 %v72_v2, %v545_v0 }
  0x19   :  { %s540_s13 = sld [smem:[#allocation4 + $0x2]]  ;;  %v83_v4 = vstv %s348_s3  ;;  %v76_v7 = vmul.f32 %v550_v1, %v75_v3 }
  0x1a   :  { %s552_s18 = sld [smem:[#allocation2 + $0x180]]  ;;  %v86_v5 = vstv %s349_s9  ;;  %v84_v8 = vmul.f32 %v83_v4, %v545_v0 }
  0x1b   :  { %s554_s19 = sld [smem:[#allocation2 + $0x181]]  ;;  %v87_v9 = vmul.f32 %v550_v1, %v86_v5  ;;  %v77_v12 = vadd.f32 %v76_v7, %v73_v6  ;;  %v79_v13 = vstv %s536_s10 }
  0x1c   :  { %s556_s20 = sld [smem:[#allocation4 + $0x3]]  ;;  %v90_v15 = vstv %s538_s11 }
  0x1d   :  { %s560_s21 = sld [smem:[#allocation2 + $0x200]]  ;;  %v94_v10 = vstv %s351_s4  ;;  %v88_v14 = vadd.f32 %v87_v9, %v84_v8  ;;  %v80_v20 = vadd.f32 %v79_v13, %v77_v12 }
  0x1e   :  { %s564_s0 = sld [smem:[#allocation2 + $0x201]]  ;;  %v97_v11 = vstv %s352_s12  ;;  %v95_v16 = vmul.f32 %v94_v10, %v545_v0 }
  0x1f   :  { %s566_s22 = sld [smem:[#allocation4 + $0x4]]  ;;  %v98_v17 = vmul.f32 %v550_v1, %v97_v11  ;;  %v91_v21 = vadd.f32 %v90_v15, %v88_v14  ;;  %v101_v27 = vstv %s540_s13  ;;  %410 = vtanh.f32 %v80_v20 }
  0x20   :  { %s568_s23 = sld [smem:[#allocation2 + $0x280]]  ;;  %v105_v18 = vstv %s552_s18 }
  0x21   :  { %s570_s24 = sld [smem:[#allocation2 + $0x281]]  ;;  %v108_v19 = vstv %s554_s19  ;;  %v99_v24 = vadd.f32 %v98_v17, %v95_v16  ;;  %v106_v25 = vmul.f32 %v105_v18, %v545_v0  ;;  %412 = vtanh.f32 %v91_v21 }
  0x22   :  { %s573_s25 = sld [smem:[#allocation4 + $0x5]]  ;;  %v109_v26 = vmul.f32 %v550_v1, %v108_v19  ;;  %v112_v34 = vstv %s556_s20 }
  0x23   :  { %s578_s26 = sld [smem:[#allocation2 + $0x300]]  ;;  %v116_v22 = vstv %s560_s21  ;;  %v102_v30 = vadd.f32 %v101_v27, %v99_v24 }
  0x24   :  { %s582_s27 = sld [smem:[#allocation2 + $0x301]]  ;;  %v119_v23 = vstv %s564_s0  ;;  %v117_v28 = vmul.f32 %v116_v22, %v545_v0  ;;  %v110_v31 = vadd.f32 %v109_v26, %v106_v25 }
  0x25   :  { %s584_s28 = sld [smem:[#allocation4 + $0x6]]  ;;  %v120_v29 = vmul.f32 %v550_v1, %v119_v23  ;;  %v123_v36 = vstv %s566_s22  ;;  %v617_v39 = vpop.eup %410  ;;  %414 = vtanh.f32 %v102_v30 }
  0x26   :  { %s588_s29 = sld [smem:[#allocation2 + $0x380]]  ;;  %v127_v32 = vstv %s568_s23  ;;  %v113_v40 = vadd.f32 %v112_v34, %v110_v31 }
  0x27   :  { %s592_s30 = sld [smem:[#allocation2 + $0x381]]  ;;  %v130_v33 = vstv %s570_s24  ;;  %v121_v35 = vadd.f32 %v120_v29, %v117_v28  ;;  %v128_v37 = vmul.f32 %v127_v32, %v545_v0  ;;  %v621_v43 = vpop.eup %412 }
  0x28   :  { %s595_s2 = sld [smem:[#allocation6]]  ;;  %v131_v38 = vmul.f32 %v550_v1, %v130_v33  ;;  %416 = vtanh.f32 %v113_v40  ;;  %v134_v50 = vstv %s573_s25 }
  0x29   :  { %s599_s6 = sld [smem:[#allocation6 + $0x1]]  ;;  %v138_v41 = vstv %s578_s26  ;;  %v124_v44 = vadd.f32 %v123_v36, %v121_v35 }
  0x2a   :  { %s601_s7 = sld [smem:[#allocation4 + $0x7]]  ;;  %v141_v42 = vstv %s582_s27  ;;  %v132_v47 = vadd.f32 %v131_v38, %v128_v37  ;;  %v139_v48 = vmul.f32 %v138_v41, %v545_v0 }
  0x2b   :  { %s605_s1 = sld [smem:[#allocation6 + $0x2]]  ;;  %v142_v49 = vmul.f32 %v550_v1, %v141_v42  ;;  %v640_v55 = vpop.eup %414  ;;  %418 = vtanh.f32 %v124_v44  ;;  %v145_v56 = vstv %s584_s28 }
  0x2c   :  { %s608_s8 = sld [smem:[#allocation6 + $0x3]]  ;;  %v149_v51 = vstv %s588_s29  ;;  %v135_v59 = vadd.f32 %v134_v50, %v132_v47 }
  0x2d   :  { %s610_s3 = sld [smem:[#allocation6 + $0x4]]  ;;  %v152_v52 = vstv %s592_s30  ;;  %v143_v60 = vadd.f32 %v142_v49, %v139_v48  ;;  %v150_v63 = vmul.f32 %v149_v51, %v545_v0 }
  0x2e   :  { %s615_s9 = sld [smem:[#allocation6 + $0x5]]  ;;  %v160_v45 = vstv %s595_s2  ;;  %v153_v2 = vmul.f32 %v550_v1, %v152_v52  ;;  %v656_v7 = vpop.eup %416  ;;  %420 = vtanh.f32 %v135_v59 }
  0x2f   :  { %s376_s10 = sld [smem:[#allocation6 + $0x80]]  ;;  %v163_v46 = vstv %s599_s6  ;;  %v161_v53 = vmul.f32 %v617_v39, %v160_v45  ;;  %v146_v0 = vadd.f32 %v145_v56, %v143_v60 }
  0x30   :  { %s377_s11 = sld [smem:[#allocation6 + $0x81]]  ;;  %v164_v54 = vmul.f32 %v621_v43, %v163_v46  ;;  %v154_v12 = vadd.f32 %v153_v2, %v150_v63  ;;  %v156_v13 = vstv %s601_s7 }
  0x31   :  { %s625_s4 = sld [smem:[#allocation6 + $0x82]]  ;;  %v167_v57 = vstv %s605_s1  ;;  %v661_v11 = vpop.eup %418  ;;  %422 = vtanh.f32 %v146_v0 }
  0x32   :  { %s629_s12 = sld [smem:[#allocation6 + $0x83]]  ;;  %v165_v5 = vadd.f32 %v164_v54, %v161_v53  ;;  %v168_v6 = vmul.f32 %v640_v55, %v167_v57  ;;  %v171_v8 = vstv %s608_s8  ;;  %v157_v21 = vadd.f32 %v156_v13, %v154_v12 }
  0x33   :  { %s632_s13 = sld [smem:[#allocation6 + $0x6]]  ;;  %v172_v15 = vmul.f32 %v656_v7, %v171_v8  ;;  %v175_v16 = vstv %s610_s3 }
  0x34   :  { %s638_s14 = sld [smem:[#allocation6 + $0x7]]  ;;  %v169_v14 = vadd.f32 %v168_v6, %v165_v5  ;;  %v176_v22 = vmul.f32 %v661_v11, %v175_v16  ;;  %v680_v25 = vpop.eup %420  ;;  %v179_v27 = vstv %s615_s9  ;;  %424 = vtanh.f32 %v157_v21 }
  0x35   :  { %v194_v58 = vstv %s376_s10  ;;  %s644_s15 = sld [smem:[#allocation6 + $0x84]]  ;;  %v180_v38 = vmul.f32 %v680_v25, %v179_v27 }
  0x36   :  { %v195_v61 = vmul.f32 %v617_v39, %v194_v58  ;;  %v197_v62 = vstv %s377_s11  ;;  %s647_s16 = sld [smem:[#allocation6 + $0x85]]  ;;  %v173_v26 = vadd.f32 %v172_v15, %v169_v14 }
  0x37   :  { %v198_v3 = vmul.f32 %v621_v43, %v197_v62  ;;  %v201_v4 = vstv %s625_s4  ;;  %s653_s17 = sld [smem:[#allocation6 + $0x86]]  ;;  %v423_v41 = vpop.eup %422 }
  0x38   :  { %s385_s18 = sld [smem:[#allocation6 + $0x100]]  ;;  %v202_v10 = vmul.f32 %v640_v55, %v201_v4  ;;  %v205_v1 = vstv %s629_s12  ;;  %v177_v42 = vadd.f32 %v176_v22, %v173_v26 }
  0x39   :  { %v199_v9 = vadd.f32 %v198_v3, %v195_v61  ;;  %s386_s19 = sld [smem:[#allocation6 + $0x101]]  ;;  %v206_v18 = vmul.f32 %v656_v7, %v205_v1  ;;  %v183_v40 = vstv %s632_s13 }
  0x3a   :  { %s387_s20 = sld [smem:[#allocation6 + $0x102]]  ;;  %v187_v49 = vstv %s638_s14  ;;  %v184_v52 = vmul.f32 %v423_v41, %v183_v40  ;;  %v181_v57 = vadd.f32 %v180_v38, %v177_v42  ;;  %v425_v61 = vpop.eup %424 }
  0x3b   :  { %s663_s21 = sld [smem:[#allocation6 + $0x103]]  ;;  %v203_v17 = vadd.f32 %v202_v10, %v199_v9  ;;  %v209_v19 = vstv %s644_s15  ;;  %v188_v12 = vmul.f32 %v425_v61, %v187_v49 }
  0x3c   :  { %s668_s0 = sld [smem:[#allocation6 + $0x104]]  ;;  %v210_v31 = vmul.f32 %v661_v11, %v209_v19  ;;  %v213_v34 = vstv %s647_s16  ;;  %v185_v1 = vadd.f32 %v184_v52, %v181_v57 }
  0x3d   :  { %s671_s22 = sld [smem:[#allocation6 + $0x105]]  ;;  %v207_v30 = vadd.f32 %v206_v18, %v203_v17  ;;  %v214_v48 = vmul.f32 %v680_v25, %v213_v34  ;;  %v217_v50 = vstv %s653_s17 }
  0x3e   :  { %s674_s23 = sld [smem:[#allocation6 + $0x87]]  ;;  %v228_v20 = vstv %s385_s18  ;;  %v218_v63 = vmul.f32 %v423_v41, %v217_v50  ;;  %v189_v22 = vadd.f32 %v188_v12, %v185_v1 }
  0x3f   :  { %v229_v23 = vmul.f32 %v617_v39, %v228_v20  ;;  %v231_v24 = vstv %s386_s19  ;;  %s678_s24 = sld [smem:[#allocation6 + $0x106]]  ;;  %v211_v47 = vadd.f32 %v210_v31, %v207_v30 }
  0x40   :  { %v232_v28 = vmul.f32 %v621_v43, %v231_v24  ;;  %v235_v29 = vstv %s387_s20  ;;  %s684_s25 = sld [smem:[#allocation6 + $0x107]] }
  0x41   :  { %v236_v32 = vmul.f32 %v640_v55, %v235_v29  ;;  %v239_v33 = vstv %s663_s21  ;;  %s394_s26 = sld [smem:[#allocation6 + $0x180]]  ;;  %v215_v62 = vadd.f32 %v214_v48, %v211_v47 }
  0x42   :  { %v233_v35 = vadd.f32 %v232_v28, %v229_v23  ;;  %v240_v36 = vmul.f32 %v656_v7, %v239_v33  ;;  %v243_v37 = vstv %s668_s0  ;;  %s692_s27 = sld [smem:[#allocation6 + $0x181]] }
  0x43   :  { %s696_s28 = sld [smem:[#allocation6 + $0x182]]  ;;  %v244_v45 = vmul.f32 %v661_v11, %v243_v37  ;;  %v247_v46 = vstv %s671_s22  ;;  %v219_v14 = vadd.f32 %v218_v63, %v215_v62 }
  0x44   :  { %v237_v44 = vadd.f32 %v236_v32, %v233_v35  ;;  %s700_s29 = sld [smem:[#allocation6 + $0x183]]  ;;  %v248_v53 = vmul.f32 %v680_v25, %v247_v46  ;;  %v221_v4 = vstv %s674_s23 }
  0x45   :  { %s703_s30 = sld [smem:[#allocation6 + $0x184]]  ;;  %v251_v54 = vstv %s678_s24  ;;  %v222_v15 = vmul.f32 %v425_v61, %v221_v4 }
  0x46   :  { %v241_v51 = vadd.f32 %v240_v36, %v237_v44  ;;  %s707_s2 = sld [smem:[#allocation6 + $0x185]]  ;;  %v252_v5 = vmul.f32 %v423_v41, %v251_v54  ;;  %v255_v13 = vstv %s684_s25 }
  0x47   :  { %v262_v56 = vstv %s394_s26  ;;  %s711_s6 = sld [smem:[#allocation6 + $0x186]]  ;;  %v256_v19 = vmul.f32 %v425_v61, %v255_v13  ;;  %v223_v23 = vadd.f32 %v222_v15, %v219_v14 }
  0x48   :  { %v245_v58 = vadd.f32 %v244_v45, %v241_v51  ;;  %v263_v59 = vmul.f32 %v617_v39, %v262_v56  ;;  %v265_v60 = vstv %s692_s27  ;;  %s715_s7 = sld [smem:[#allocation6 + $0x187]] }
  0x49   :  { %s717_s1 = sld [smem:[#allocation7]]  ;;  %v266_v2 = vmul.f32 %v621_v43, %v265_v60  ;;  %v269_v3 = vstv %s696_s28 }
  0x4a   :  { %s722_s8 = sld [smem:[#allocation7 + $0x1]]  ;;  %v270_v39 = vmul.f32 %v640_v55, %v269_v3  ;;  %v273_v6 = vstv %s700_s29  ;;  %v249_v8 = vadd.f32 %v248_v53, %v245_v58 }
  0x4b   :  { %v267_v9 = vadd.f32 %v266_v2, %v263_v59  ;;  %v274_v10 = vmul.f32 %v656_v7, %v273_v6  ;;  %v277_v0 = vstv %s703_s30  ;;  %s393_s3 = sld [smem:[#allocation7 + $0x2]] }
  0x4c   :  { %v281_v43 = vstv %s707_s2  ;;  %v278_v17 = vmul.f32 %v661_v11, %v277_v0  ;;  %s402_s9 = sld [smem:[#allocation7 + $0x3]]  ;;  %v253_v18 = vadd.f32 %v252_v5, %v249_v8 }
  0x4d   :  { %v271_v16 = vadd.f32 %v270_v39, %v267_v9  ;;  %v285_v55 = vstv %s711_s6  ;;  %v282_v7 = vmul.f32 %v680_v25, %v281_v43 }
  0x4e   :  { %v289_v21 = vstv %s715_s7  ;;  %v286_v26 = vmul.f32 %v423_v41, %v285_v55  ;;  %v257_v29 = vadd.f32 %v256_v19, %v253_v18 }
  0x4f   :  { %v275_v20 = vadd.f32 %v274_v10, %v271_v16  ;;  %v191_v27 = vstv %s717_s1  ;;  %v290_v31 = vmul.f32 %v425_v61, %v289_v21 }
  0x50   :  { %v225_v28 = vstv %s722_s8  ;;  %v192_v33 = vadd.f32 %v191_v27, %v189_v22 }
  0x51   :  { %v279_v24 = vadd.f32 %v278_v17, %v275_v20  ;;  %v259_v32 = vstv %s393_s3  ;;  %v226_v11 = vadd.f32 %v225_v28, %v223_v23 }
  0x52   :  { %v293_v35 = vstv %s402_s9  ;;  %v260_v36 = vadd.f32 %v259_v32, %v257_v29 }
  0x53   :  { %v283_v30 = vadd.f32 %v282_v7, %v279_v24  ;;  %v295_v40 = vmax.f32 %v192_v33, %v226_v11 }
  0x55   :  { %v287_v34 = vadd.f32 %v286_v26, %v283_v30 }
  0x57   :  { %v291_v37 = vadd.f32 %v290_v31, %v287_v34 }
  0x59   :  { %v294_v38 = vadd.f32 %v293_v35, %v291_v37 }
  0x5b   :  { %v296_v25 = vmax.f32 %v260_v36, %v294_v38 }
  0x5d   :  { %v297_v42 = vmax.f32 %v295_v40, %v296_v25 }
  0x5f   :  { %v298_v44 = vsub.f32 %v192_v33, %v297_v42  ;;  %v301_v45 = vsub.f32 %v226_v11, %v297_v42  ;;  %v304_v46 = vsub.f32 %v260_v36, %v297_v42  ;;  %v307_v41 = vsub.f32 %v294_v38, %v297_v42 }
  0x61   :  { %v299_v47 = vmul.f32 1.442695, %v298_v44  ;;  %v302_v48 = vmul.f32 1.442695, %v301_v45  ;;  %v305_v49 = vmul.f32 1.442695, %v304_v46 }
  0x62   :  { %v308_v50 = vmul.f32 1.442695, %v307_v41 }
  0x63   :  { %426 = vpow2.f32 %v299_v47 }
  0x64   :  { %428 = vpow2.f32 %v302_v48 }
  0x65   :  { %430 = vpow2.f32 %v305_v49 }
  0x66   :  { %432 = vpow2.f32 %v308_v50 }
  0x69   :  { %v427_v51 = vpop.eup %426 }
  0x6a   :  { %v429_v52 = vpop.eup %428 }
  0x6b   :  { %v431_v53 = vpop.eup %430  ;;  %v310_v54 = vadd.f32 %v429_v52, %v427_v51 }
  0x6c   :  { %v433_v56 = vpop.eup %432 }
  0x6d   :  { %v311_v57 = vadd.f32 %v431_v53, %v310_v54 }
  0x6f   :  { %v312_v58 = vadd.f32 %v433_v56, %v311_v57 }
  0x71   :  { %434 = vrcp.f32 %v312_v58  ;;  %v324_v61 = vand.u32 2147483648, %v312_v58  ;;  %vm318_vm0 = vweird.f32 %v312_v58  ;;  %v322_v63 = vand.u32 2147483647, %v312_v58 }
  0x73   :  { %v325_v3 = vor.u32 1.1754944e-38, %v324_v61  ;;  %vm323_vm3 = vcmp.eq.f32.partialorder %v322_v63, 8.507059e+37 }
  0x77   :  { %v435_v59 = vpop.eup %434 }
  0x78   :  { %v314_v60 = vmul.f32 %v435_v59, %v312_v58  ;;  %vm319_vm1 = vweird.f32 %v435_v59 }
  0x79   :  { %vm320_vm2 = vmor %vm318_vm0, %vm319_vm1 }
  0x7a   :  { %v315_v62 = vsub.f32 1.0, %v314_v60 }
  0x7c   :  { %v316_v2 = vmul.f32 %v435_v59, %v315_v62 }
  0x7e   :  { %v317_v4 = vadd.f32 %v435_v59, %v316_v2 }
  0x80   :  { %v321_v5 = vsel %vm320_vm2, %v435_v59, %v317_v4 }
  0x81   :  { %v326_v39 = vsel %vm323_vm3, %v325_v3, %v321_v5 }
  0x82   :  { %v328_v6 = vmul.f32 %v427_v51, %v326_v39  ;;  %v330_v8 = vmul.f32 %v429_v52, %v326_v39  ;;  %v333_v9 = vmul.f32 %v431_v53, %v326_v39  ;;  %v336_v10 = vmul.f32 %v433_v56, %v326_v39 }
  0x84   :  { %329 = vst [vmem:[%s753_s5] sm:$0xff] %v328_v6 }
  0x85   :  { %403 = vst [vmem:[%s753_s5 + $0x8] sm:$0xff] %v330_v8 }
  0x86   :  { %404 = vst [vmem:[%s753_s5 + $0x10] sm:$0xff] %v333_v9 }
  0x87   :  { %405 = vst [vmem:[%s753_s5 + $0x18] sm:$0xff] %v336_v10 }
  0x88   :  { %343 = vsyncpa [#allocation3], 1 }
  0x89   :  { %344 = vsyncpa [#allocation5], 1 }
  0x8a   :  { %345 = vsyncpa [#allocation8], 1 }

</bundles_post_ra>
